<compile_context>
chip_gen: v6e
topology: v6e:2x2x1
jax: 0.10.0
libtpu: 0.0.40
codegen_flags: <defaults>
</compile_context>

<pallas_src>
from functools import partial

import jax
import jax.numpy as jnp
from jax.experimental import pallas as pl
from jax.experimental.pallas import tpu as pltpu


def _round_up(x, m):
    return ((x + m - 1) // m) * m


def _fused_proto_kernel(x_ref, w_ref, o_ref):
    # One MXU matmul per (batch-tile, K-tile); f32 accumulation, cast on store.
    o_ref[...] = jnp.dot(
        x_ref[...], w_ref[...], preferred_element_type=jnp.float32
    ).astype(o_ref.dtype)


def fused_prototypes_matmul(x, w_cat, *, out_dtype=None, tb_max=256, tn_max=1024):
    """x: (B, D) activations (already in compute dtype); w_cat: (D, K_pad).

    Returns (B, K_pad) = x @ w_cat via a single pallas_call with a 2-D
    (K-tiles outer, batch-tiles inner) fully-parallel grid.
    """
    B, D = x.shape
    Dw, K_pad = w_cat.shape
    assert D == Dw, "feature dims must match"
    assert K_pad % 128 == 0, "fused K must be lane-dense (multiple of 128)"
    out_dtype = x.dtype if out_dtype is None else jnp.dtype(out_dtype)

    # Batch tile: whole batch when small (block dim == full array dim is always
    # legal), 256-row tiles when large (ragged last block handled by Pallas).
    tb = B if B <= tb_max else tb_max
    # K tile: lane-dense multiple of 128, capped so blocks stay well inside the
    # default scoped VMEM on all generations (v5e 16 MiB, v6e/v7x 32 MiB).
    tn = K_pad if K_pad <= tn_max else tn_max

    n_b = pl.cdiv(B, tb)
    n_k = pl.cdiv(K_pad, tn)
    # v7x has 2 TensorCores: make sure there are >=2 parallel grid steps
    # whenever there is enough work to split.
    if n_b * n_k < 2:
        if K_pad >= 256:
            tn = _round_up(pl.cdiv(K_pad, 2), 128)
            n_k = pl.cdiv(K_pad, tn)
        elif B >= 16:
            tb = _round_up(pl.cdiv(B, 2), 8)
            n_b = pl.cdiv(B, tb)

    in_item = jnp.dtype(x.dtype).itemsize
    out_item = jnp.dtype(out_dtype).itemsize
    block_bytes = tb * D * in_item + D * tn * in_item + tb * tn * out_item
    # Double-buffered blocks (x2) with generous headroom, capped v7x-safe.
    vmem_limit = min(4 * block_bytes + (16 << 20), 48 << 20)

    return pl.pallas_call(
        _fused_proto_kernel,
        out_shape=jax.ShapeDtypeStruct((B, K_pad), out_dtype),
        # K tiles outer, batch tiles inner: the weight tile's block index is
        # constant across the inner axis, so it is not re-DMA'd per batch tile.
        grid=(n_k, n_b),
        in_specs=[
            # x tile: (tb, D); last dim == full array dim, so any D is legal.
            pl.BlockSpec((tb, D), lambda j, i: (i, 0)),
            # Weight tile: (D, tn); depends only on the outer K index.
            pl.BlockSpec((D, tn), lambda j, i: (0, j)),
        ],
        out_specs=pl.BlockSpec((tb, tn), lambda j, i: (i, j)),
        compiler_params=pltpu.CompilerParams(
            # No reduction axis exists (D is un-tiled): both axes independent.
            dimension_semantics=("parallel", "parallel"),
            vmem_limit_bytes=vmem_limit,
        ),
    )(x, w_cat)


@partial(jax.jit, static_argnames=("head_sizes", "padded_offsets", "out_dtype"))
def _multi_prototypes_forward(x, w_cat, head_sizes, padded_offsets, out_dtype):
    # Cast activations to the (bf16) compute dtype once; halves x DMA traffic.
    x = x.astype(w_cat.dtype)
    out_full = fused_prototypes_matmul(x, w_cat, out_dtype=out_dtype)
    # Per-head views start at 128-aligned lane offsets (cheap slices).
    return tuple(
        out_full[:, off:off + k] for k, off in zip(head_sizes, padded_offsets)
    )


class MultiPrototypes:
    """JAX/Pallas port of the PyTorch MultiPrototypes module (bias-free heads)."""

    def __init__(self, output_dim, nmb_prototypes, key,
                 param_dtype=jnp.bfloat16, out_dtype=None):
        self.nmb_heads = len(nmb_prototypes)
        self.head_sizes = tuple(int(k) for k in nmb_prototypes)
        self.output_dim = int(output_dim)
        self.param_dtype = jnp.dtype(param_dtype)
        # None -> outputs match the input dtype (PyTorch semantics). Pass
        # jnp.bfloat16 here if downstream (SwAV softmax) tolerates bf16 logits;
        # the kernel is output-HBM-write bound at realistic sizes.
        self.out_dtype = None if out_dtype is None else jnp.dtype(out_dtype)

        # Per-head weights in PyTorch convention (k_i, D), f32 master copies.
        keys = jax.random.split(key, self.nmb_heads)
        bound = 1.0 / (output_dim ** 0.5)
        self.weights = []
        for k_i, subkey in zip(self.head_sizes, keys):
            w = jax.random.uniform(
                subkey, (k_i, output_dim), dtype=jnp.float32,
                minval=-bound, maxval=bound,
            )
            self.weights.append(w)

        # Fused, pre-transposed, lane-dense weight (D, K_pad) in bf16.
        # Each head's column block is padded to a multiple of 128 so per-head
        # slices of the fused output start at lane-aligned offsets.
        self.padded_sizes = tuple(_round_up(k, 128) for k in self.head_sizes)
        offs, off = [], 0
        for kp in self.padded_sizes:
            offs.append(off)
            off += kp
        self.padded_offsets = tuple(offs)

        cols = []
        for w, k_i, kp in zip(self.weights, self.head_sizes, self.padded_sizes):
            wt = w.T.astype(self.param_dtype)          # (D, k_i)
            if kp != k_i:
                wt = jnp.pad(wt, ((0, 0), (0, kp - k_i)))
            cols.append(wt)
        self.w_cat = jnp.concatenate(cols, axis=1)     # (D, K_pad)
        assert self.w_cat.shape == (self.output_dim, off)
        assert self.w_cat.shape[1] % 128 == 0

    def __call__(self, x):
        out_dtype = jnp.dtype(x.dtype) if self.out_dtype is None else self.out_dtype
        outs = _multi_prototypes_forward(
            x, self.w_cat, self.head_sizes, self.padded_offsets, out_dtype
        )
        return list(outs)


if __name__ == "__main__":
    key = jax.random.PRNGKey(0)
    k_x, k_w = jax.random.split(key)

    batch = 8
    output_dim = 32
    nmb_prototypes = [16, 24, 48]

    x = jax.random.normal(k_x, (batch, output_dim), dtype=jnp.float32)

    model = MultiPrototypes(output_dim, nmb_prototypes, k_w)
    outs = model(x)
    outs = jax.block_until_ready(outs)

    # Correctness check: reference reproduces the kernel's numerics
    # (bf16 storage of x and W, f32 accumulation).
    x_bf = x.astype(jnp.bfloat16).astype(jnp.float32)
    for o, w, k_i in zip(outs, model.weights, model.head_sizes):
        w_bf = w.astype(jnp.bfloat16).astype(jnp.float32)
        ref = x_bf @ w_bf.T
        assert o.shape == (batch, k_i), (o.shape, (batch, k_i))
        assert o.dtype == x.dtype, (o.dtype, x.dtype)
        assert jnp.allclose(o.astype(jnp.float32), ref, atol=1e-4, rtol=1e-4), \
            float(jnp.max(jnp.abs(o.astype(jnp.float32) - ref)))

    print("KERNEL_OK")
</pallas_src>

<mosaic_0001>
module attributes {stable_mosaic.version = 11 : i64} {
  func.func @_fused_proto_kernel(%arg0: i32, %arg1: i32, %arg2: memref<8x32xbf16, #tpu.memory_space<vmem>>, %arg3: memref<32x256xbf16, #tpu.memory_space<vmem>>, %arg4: memref<8x256xf32, #tpu.memory_space<vmem>>) attributes {dimension_semantics = [#tpu.dimension_semantics<parallel>, #tpu.dimension_semantics<parallel>], iteration_bounds = array<i64: 2, 1>, scalar_prefetch = 0 : i64, scratch_operands = 0 : i64, tpu.core_type = #tpu.core_type<tc>, window_params = [{transform_indices = @transform_0, window_bounds = array<i64: 8, 32>}, {transform_indices = @transform_1, window_bounds = array<i64: 32, 256>}, {transform_indices = @transform_2, window_bounds = array<i64: 8, 256>}]} {
    %c0 = arith.constant 0 : index
    %c0_0 = arith.constant 0 : index
    %0 = vector.load %arg2[%c0, %c0_0] : memref<8x32xbf16, #tpu.memory_space<vmem>>, vector<8x32xbf16>
    %c0_1 = arith.constant 0 : index
    %c0_2 = arith.constant 0 : index
    %1 = vector.load %arg3[%c0_1, %c0_2] : memref<32x256xbf16, #tpu.memory_space<vmem>>, vector<32x256xbf16>
    %cst = arith.constant dense<0.000000e+00> : vector<8x256xf32>
    %2 = tpu.matmul %0, %1, %cst {dimension_numbers = #tpu.dot_dimension_numbers<[1], [0], [0], [1], [0, 0, 1, 1], [], []>} : vector<8x32xbf16>, vector<32x256xbf16>, vector<8x256xf32> -> vector<8x256xf32>
    %c0_3 = arith.constant 0 : index
    %c0_4 = arith.constant 0 : index
    %3 = vector.load %arg4[%c0_3, %c0_4] : memref<8x256xf32, #tpu.memory_space<vmem>>, vector<8x256xf32>
    tpu.vector_store %arg4[%c0_3, %c0_4], %2 {strides = array<i32>} : memref<8x256xf32, #tpu.memory_space<vmem>>, vector<8x256xf32>,
    return
  }
  func.func @transform_0(%arg0: i32, %arg1: i32) -> (i32, i32) {
    %c0_i32 = arith.constant 0 : i32
    %c0_i32_0 = arith.constant 0 : i32
    return %arg1, %c0_i32 : i32, i32
  }
  func.func @transform_1(%arg0: i32, %arg1: i32) -> (i32, i32) {
    %c0_i32 = arith.constant 0 : i32
    %c0_i32_0 = arith.constant 0 : i32
    return %c0_i32, %arg0 : i32, i32
  }
  func.func @transform_2(%arg0: i32, %arg1: i32) -> (i32, i32) {
    %c0_i32 = arith.constant 0 : i32
    return %arg1, %arg0 : i32, i32
  }
}

</mosaic_0001>

<bundles_post_ra>
// kernel: _multi_prototypes_forward.1
= control target key start
LH: loop header
LB: loop body
LE: loop exit
PB: predicated region body
PF: predicated region fallthrough
CT: control target
= control target key end

     0   :  { %7 = vsyncpa [#allocation3], 0  ;;  %s1863_s0 = inlined_call_operand.vmem [shape: bf16[8,32], index: 0, kind: input, shape index: {}]   ;;  %s1864_s1 = inlined_call_operand.hbm [shape: bf16[32,384], index: 1, kind: input, shape index: {}]   ;;  %s1865_s2 = inlined_call_operand.vmem [shape: f32[8,384], index: 2, kind: output, shape index: {}]  }
   0x1   :  { %9 = vsyncpa [#allocation3 + $0x1], 0  ;;  %s1344_s9 = smov 0   ;;  %s1346_s10 = smov 0  }
   0x2   :  { %s1348_s11 = smov 0   ;;  %s1350_s12 = smov 0  }
   0x3   :  { %s1352_s13 = smov 0   ;;  %s1354_s14 = smov 0  }
   0x4 LB: > { %s869_s15 = sadd.s32 4294967295, %s1257_s14   ;;  %s27_s16 = sadd.s32 1, %s1253_s13  ;;  %s1257_s14 = sphi %s1354_s14, %s15_s14   ;;  %s1253_s13 = sphi %s1352_s13, %s1882_s13   ;;  %s1249_s12 = sphi %s1350_s12, %s1881_s12   ;;  %s1245_s11 = sphi %s1348_s11, %s1880_s11   ;;  %s1241_s10 = sphi %s1346_s10, %s1879_s10   ;;  %s1237_s9 = sphi %s1344_s9, %s1878_s9  }
   0x5   : > { %p29_p0 = scmp.ge.s32.totalorder %s27_s16, 2  ;;  %s60_s17 = sadd.s32 1, %s1245_s11 }
   0x6   : > { %p67_p1 = scmp.ne.s32.totalorder %s1245_s11, %s1241_s10  ;;  %p68_p2 = scmp.eq.s32.totalorder %s1257_s14, 0 }
   0x7   : > { %s1884_s16 = smov (%p29_p0, %s27_s16), 0  ;;  %p73_p4 = scmp.ne.s32.totalorder %s1241_s10, %s1237_s9 }
   0x8   : > { %p69_p3 = por %p68_p2, %p67_p1  ;;  %s57_s18 = ssub.s32 %s1253_s13, %s1884_s16 }
   0x9   : > { %p74_p5 = scmp.eq.s32.totalorder %s869_s15, 0  ;;  %p58_p6 = scmp.eq.s32.totalorder %s57_s18, 0 }
   0xa   : > { %p99_p7 = scmp.eq.s32.totalorder %s869_s15, 1  ;;  %p873_p10 = scmp.ge.s32.totalorder %s1257_s14, 2 }
   0xb   : > { %p1383_p8 = por %p74_p5, %p73_p4 }
   0xc   : > { %s1388_s20 = scalar_select %p58_p6, %s1245_s11, %s60_s17  }
   0xd   : > { %p1390_p9 = por %p99_p7, %p67_p1  ;;  %128 = sbr.rel (%p873_p10) target bundleno = 41 (0x29), region = 20 }
  0x12   : > { %131 = sbr.rel (!%p69_p3) target bundleno = 41 (0x29), region = 24  ;;  %s132_s22 = sand.u32 (%p69_p3), 1, %s1245_s11  }
  0x13   : > { %s875_s23 = sshll.u32 (%p69_p3), %s1253_s13, 1  ;;  %s874_s24 = sshll.u32 (%p69_p3), %s132_s22, 5 }
  0x14   : > { %s138_s25 = ssub.s32 (%p69_p3), 3, %s875_s23  ;;  %s1403_s28 = scalar_lea.sflag (%p69_p3), [#allocation3], %s132_s22 }
  0x15   : > { %p139_p11 = scmp.lt.s32.totalorder (%p69_p3), %s138_s25, 2  ;;  %s136_s29 = scalar_lea.vmem (%p69_p3), [#allocation2], %s874_s24 }
  0x17   : > { %s1886_s25 = smov (!%p139_p11, %s138_s25), 2 }
  0x18   : > { %s1400_s26 = sshll.u32 %s1886_s25, 8 }
  0x19   : > { %s143_s27 = ssub.s32 512, %s1400_s26 }
  0x1a   : > { %144 = vsyncadd %s1403_s28, %s143_s27  ;;  %p877_p12 = scmp.ne.s32.totalorder %s1400_s26, 0  ;;  %s921_s30 = sshll.u32 %s1253_s13, 7 }
  0x1b   : > { %s147_s5 = scalar_lea.hbm %s1864_s1, %s921_s30  ;;  %s879_s6 = sshll.u32 %s1886_s25, 2 }
  0x1c   : > { %s150_s7 = sshll.u32 %s136_s29, 4  ;;  %s1323_s9 = smov [#allocation2]   ;;  %s151_s7 = int_to_ptr.vmem [resolvable:$true] %s150_s7 }
  0x1d   : > { %s1129_s8 = scalar_lea.vmem %s151_s7, %s1400_s26  ;;  %s1133_s15 = sshll.u32 %s1323_s9, 4  ;;  %s1134_s15 = int_to_ptr.vmem [resolvable:$false] %s1133_s15 }
  0x1e   : > { %p1130_p13 = scmp.ne.s32.totalorder %s151_s7, %s1129_s8  ;;  %s1135_s17 = scalar_lea.vmem %s1134_s15, 1024 }
  0x1f   : > { %p1136_p2 = scmp.lt.s32.totalorder %s151_s7, %s1134_s15  ;;  %p1137_p3 = scmp.lt.s32.totalorder %s1135_s17, %s1129_s8 }
  0x20   : > { %p1131_p0 = pnand %p1130_p13, %p877_p12 }
  0x21   : > { %p1138_p4 = por %p1137_p3, %p1136_p2 }
  0x22   : > { %p1132_p1 = pneg %p1131_p0 }
  0x24   : > { %p1139_p5 = pnand %p1138_p4, %p1132_p1 }
  0x26   : > { %1142 = shalt.err (!%p1139_p5)
}
  0x27   : > { %s1324_s18 = smov 192   ;;  %s1325_s22 = smov 128  }
  0x28   : > { %156 = dma.hbm_to_vmem [thread:$0]  (%p877_p12), %s147_s5, %s1400_s26, %s151_s7, %s1403_s28, %s1324_s18, %s1325_s22, %s879_s6  }
  0x29 PF: > { %p882_p6 = scmp.ge.s32.totalorder %s1257_s14, 1  ;;  %p158_p7 = scmp.lt.s32.totalorder %s1257_s14, 3 }
  0x2b   : > { %p159_p10 = pnand %p882_p6, %p158_p7 }
  0x2c   : > { %s164_s23 = sand.u32 (!%p159_p10), 1, %s1241_s10  }
  0x2d   : > { %162 = sbr.rel (%p159_p10) target bundleno = 405 (0x195), region = 28  ;;  %s883_s24 = sshll.u32 (!%p159_p10), %s164_s23, 5 }
  0x2e   : > { %s165_s25 = scalar_lea.sflag (!%p159_p10), [#allocation3], %s164_s23  ;;  %s168_s27 = scalar_lea.vmem (!%p159_p10), [#allocation2], %s883_s24 }
  0x32   : > { %1232 = dma.done.wait (%p1383_p8), %s165_s25, 512  }
  0x33   : > { %1234 = vsyncadd (%p1383_p8), %s165_s25, 4294966784  ;;  %v1326_v0 = vmov 0   ;;  %v1111_v1 = vld [vmem:[%s168_s27 + $0x14] ss:$8 sps:$4 sm:$0xff]   ;;  %v1113_v2 = vld [vmem:[%s168_s27 + $0x10] ss:$8 sps:$4 sm:$0xff]  }
  0x34   : > { %268 = vmatprep.mubr.bf16.mxu0 %v1326_v0  ;;  %248 = vmatprep.subr.bf16.mxu0 %v1111_v1  ;;  %v1114_v3 = vld [vmem:[%s168_s27 + $0x4] ss:$8 sps:$4 sm:$0xff]   ;;  %v1116_v4 = vld [vmem:[%s168_s27] ss:$8 sps:$4 sm:$0xff]   ;;  %vm232_vm0 = vcmask 261120   ;;  %s884_s29 = sshll.u32 %s164_s23, 4 }
  0x35   : > { %249 = vmatpush1.bf16.msra.mxu0 %v1113_v2  ;;  %v207_v5 = vld [vmem:[%s1863_s0] sm:$0xf]  ;;  %s1429_s19 = scalar_lea.vmem [#allocation4], %s884_s29   ;;  %s891_s30 = sshll.u32 (%p1390_p9), %s1249_s12, 1 }
  0x36   : > { %250 = vmatprep.subr.bf16.mxu0 %v1114_v3  ;;  %s924_s3 = sshll.u32 (%p1390_p9), %s1249_s12, 4  ;;  %s287_s4 = ssub.s32 (%p1390_p9), 3, %s891_s30 }
  0x37   : > { %s1440_s7 = scalar_lea.vmem (%p1390_p9), %s1865_s2, %s924_s3   ;;  %p288_p8 = scmp.lt.s32.totalorder (%p1390_p9), %s287_s4, 2 }
  0x39   : > { %251 = vmatpush1.bf16.msra.mxu0 %v1116_v4 }
  0x3c   : > { %889 = vmatmul.mubr.msk.bf16.vlgmr.msra.gmra.mxu0 %vm232_vm0, %v207_v5 }
  0xfc   : > { %v270_v6 = vpop.f32.mrf.mxu0 }
  0xfd   : > { %277 = vst [vmem:[%s1429_s19] sm:$0xff] %v270_v6 }
  0xfe   : > { %v272_v7 = vpop.f32.mrf.mxu0  ;;  %285 = sbr.rel (!%p1390_p9) target bundleno = 405 (0x195), region = 36 }
  0xff   : > { %278 = vst [vmem:[%s1429_s19 + $0x8] sm:$0xff] %v272_v7 }
 0x100   : > { %v274_v8 = vpop.f32.mrf.mxu0 }
 0x102   : > { %v275_v9 = vpop.f32.mrf.mxu0 }
 0x103   : > { %s1888_s4 = smov (!%p288_p8, %s287_s4), 2 }
 0x104   : > { %s892_s8 = sshll.u32 %s1888_s4, 7  ;;  %s1442_s9 = sshll.u32 %s1888_s4, 3 }
 0x105   : > { %p896_p11 = scmp.eq.s32.totalorder %s892_s8, 0 }
 0x106   : > { %p300_p12 = scmp.lt.u32.totalorder (!%p896_p11), %s1442_s9, 8 }
 0x107   : > { %299 = sbr.rel (%p896_p11) target bundleno = 405 (0x195), region = 40 }
 0x10c   : > { %303 = sbr.rel (%p300_p12) target bundleno = 396 (0x18c), region = 44  ;;  %s1446_s21 = sand.u32 (!%p300_p12), 7, %s1442_s9  }
 0x10d   : > { %p320_p9 = scmp.eq.s32.totalorder (!%p300_p12), %s1446_s21, 0  ;;  %p897_p13 = scmp.ne.s32.totalorder (!%p300_p12), %s1446_s21, 0 }
 0x111   : > { %323 = sbr.rel (%p897_p13) target bundleno = 332 (0x14c), region = 59  ;;  %s324_s12 = sshrl.u32 (!%p897_p13), %s1442_s9, 3 }
 0x112   : > { %s1453_s15 = sshrl.u32 (!%p897_p13), %s324_s12, 6 }
 0x113   : > { %p898_p0 = scmp.le.s32.totalorder (!%p897_p13), %s1453_s15, 0 }
 0x116   : > { %777 = sbr.rel (%p898_p0) target bundleno = 316 (0x13c), region = 149  ;;  %s1868_s17 = smov (!%p898_p0), %s1440_s7 }
 0x117   : > { %s1869_s18 = smov (!%p898_p0), %s1429_s19  ;;  %s1462_s22 = smov (!%p898_p0), 0  }
 0x118   : > { %s1464_s23 = smov (!%p898_p0), 0  }
 0x11b LB: >> { %v337_v10 = vld [vmem:[%s1265_s18] sm:$0xff]  ;;  %v339_v11 = vld [vmem:[%s1265_s18 + $0x8] sm:$0xff]  ;;  %v341_v12 = vld [vmem:[%s1265_s18 + $0x10] sm:$0xff]  ;;  %s465_s24 = sadd.s32 1, %s1269_s22  ;;  %s331_s23 = sadd.s32 1, %s1273_s23   ;;  %s1273_s23 = sphi %s1464_s23, %s331_s23   ;;  %s1269_s22 = sphi %s1462_s22, %s1872_s22   ;;  %s1265_s18 = sphi %s1869_s18, %s1871_s18   ;;  %s1261_s17 = sphi %s1868_s17, %s1870_s17  }
 0x11c   : >> { %338 = vst [vmem:[%s1261_s17] sm:$0xff] %v337_v10  ;;  %340 = vst [vmem:[%s1261_s17 + $0x8] sm:$0xff] %v339_v11  ;;  %v343_v13 = vld [vmem:[%s1265_s18 + $0x18] sm:$0xff]  ;;  %v345_v14 = vld [vmem:[%s1265_s18 + $0x20] sm:$0xff]  ;;  %p466_p1 = scmp.ge.s32.totalorder %s465_s24, %s1453_s15  ;;  %p330_p2 = scmp.ge.s32.totalorder %s331_s23, %s1453_s15 }
 0x11d   : >> { %342 = vst [vmem:[%s1261_s17 + $0x10] sm:$0xff] %v341_v12  ;;  %v347_v15 = vld [vmem:[%s1265_s18 + $0x28] sm:$0xff]  ;;  %344 = vst [vmem:[%s1261_s17 + $0x18] sm:$0xff] %v343_v13  ;;  %v349_v16 = vld [vmem:[%s1265_s18 + $0x30] sm:$0xff] }
 0x11e   : >> { %346 = vst [vmem:[%s1261_s17 + $0x20] sm:$0xff] %v345_v14  ;;  %348 = vst [vmem:[%s1261_s17 + $0x28] sm:$0xff] %v347_v15  ;;  %v351_v17 = vld [vmem:[%s1265_s18 + $0x38] sm:$0xff]  ;;  %v353_v18 = vld [vmem:[%s1265_s18 + $0x40] sm:$0xff]  ;;  %s1890_s24 = smov (%p466_p1, %s465_s24), 0 }
 0x11f   : >> { %350 = vst [vmem:[%s1261_s17 + $0x30] sm:$0xff] %v349_v16  ;;  %352 = vst [vmem:[%s1261_s17 + $0x38] sm:$0xff] %v351_v17  ;;  %v355_v19 = vld [vmem:[%s1265_s18 + $0x48] sm:$0xff]  ;;  %v357_v20 = vld [vmem:[%s1265_s18 + $0x50] sm:$0xff]  ;;  %s899_s25 = sshll.u32 %s1890_s24, 9  ;;  %s1872_s22 = smov %s1890_s24 }
 0x120   : >> { %354 = vst [vmem:[%s1261_s17 + $0x40] sm:$0xff] %v353_v18  ;;  %v359_v21 = vld [vmem:[%s1265_s18 + $0x58] sm:$0xff]  ;;  %356 = vst [vmem:[%s1261_s17 + $0x48] sm:$0xff] %v355_v19  ;;  %v361_v22 = vld [vmem:[%s1265_s18 + $0x60] sm:$0xff]  ;;  %s1520_s27 = scalar_lea.vmem %s1429_s19, %s899_s25 [#allocation4]   ;;  %s1523_s26 = scalar_lea.vmem %s1440_s7, %s899_s25  }
 0x121   : >> { %358 = vst [vmem:[%s1261_s17 + $0x50] sm:$0xff] %v357_v20  ;;  %360 = vst [vmem:[%s1261_s17 + $0x58] sm:$0xff] %v359_v21  ;;  %v363_v23 = vld [vmem:[%s1265_s18 + $0x68] sm:$0xff]  ;;  %v365_v24 = vld [vmem:[%s1265_s18 + $0x70] sm:$0xff] }
 0x122   : >> { %362 = vst [vmem:[%s1261_s17 + $0x60] sm:$0xff] %v361_v22  ;;  %364 = vst [vmem:[%s1261_s17 + $0x68] sm:$0xff] %v363_v23  ;;  %v367_v25 = vld [vmem:[%s1265_s18 + $0x78] sm:$0xff]  ;;  %v369_v26 = vld [vmem:[%s1265_s18 + $0x80] sm:$0xff] }
 0x123   : >> { %366 = vst [vmem:[%s1261_s17 + $0x70] sm:$0xff] %v365_v24  ;;  %v371_v27 = vld [vmem:[%s1265_s18 + $0x88] sm:$0xff]  ;;  %368 = vst [vmem:[%s1261_s17 + $0x78] sm:$0xff] %v367_v25  ;;  %v373_v28 = vld [vmem:[%s1265_s18 + $0x90] sm:$0xff] }
 0x124   : >> { %370 = vst [vmem:[%s1261_s17 + $0x80] sm:$0xff] %v369_v26  ;;  %372 = vst [vmem:[%s1261_s17 + $0x88] sm:$0xff] %v371_v27  ;;  %v375_v29 = vld [vmem:[%s1265_s18 + $0x98] sm:$0xff]  ;;  %v377_v30 = vld [vmem:[%s1265_s18 + $0xa0] sm:$0xff] }
 0x125   : >> { %374 = vst [vmem:[%s1261_s17 + $0x90] sm:$0xff] %v373_v28  ;;  %376 = vst [vmem:[%s1261_s17 + $0x98] sm:$0xff] %v375_v29  ;;  %v379_v31 = vld [vmem:[%s1265_s18 + $0xa8] sm:$0xff]  ;;  %v381_v32 = vld [vmem:[%s1265_s18 + $0xb0] sm:$0xff] }
 0x126   : >> { %378 = vst [vmem:[%s1261_s17 + $0xa0] sm:$0xff] %v377_v30  ;;  %v383_v33 = vld [vmem:[%s1265_s18 + $0xb8] sm:$0xff]  ;;  %380 = vst [vmem:[%s1261_s17 + $0xa8] sm:$0xff] %v379_v31  ;;  %v385_v34 = vld [vmem:[%s1265_s18 + $0xc0] sm:$0xff] }
 0x127   : >> { %382 = vst [vmem:[%s1261_s17 + $0xb0] sm:$0xff] %v381_v32  ;;  %384 = vst [vmem:[%s1261_s17 + $0xb8] sm:$0xff] %v383_v33  ;;  %v387_v35 = vld [vmem:[%s1265_s18 + $0xc8] sm:$0xff]  ;;  %v389_v36 = vld [vmem:[%s1265_s18 + $0xd0] sm:$0xff] }
 0x128   : >> { %386 = vst [vmem:[%s1261_s17 + $0xc0] sm:$0xff] %v385_v34  ;;  %388 = vst [vmem:[%s1261_s17 + $0xc8] sm:$0xff] %v387_v35  ;;  %v391_v37 = vld [vmem:[%s1265_s18 + $0xd8] sm:$0xff]  ;;  %v393_v38 = vld [vmem:[%s1265_s18 + $0xe0] sm:$0xff] }
 0x129   : >> { %390 = vst [vmem:[%s1261_s17 + $0xd0] sm:$0xff] %v389_v36  ;;  %v395_v39 = vld [vmem:[%s1265_s18 + $0xe8] sm:$0xff]  ;;  %392 = vst [vmem:[%s1261_s17 + $0xd8] sm:$0xff] %v391_v37  ;;  %v397_v40 = vld [vmem:[%s1265_s18 + $0xf0] sm:$0xff] }
 0x12a   : >> { %394 = vst [vmem:[%s1261_s17 + $0xe0] sm:$0xff] %v393_v38  ;;  %396 = vst [vmem:[%s1261_s17 + $0xe8] sm:$0xff] %v395_v39  ;;  %v399_v41 = vld [vmem:[%s1265_s18 + $0xf8] sm:$0xff]  ;;  %v401_v42 = vld [vmem:[%s1265_s18 + $0x100] sm:$0xff] }
 0x12b   : >> { %398 = vst [vmem:[%s1261_s17 + $0xf0] sm:$0xff] %v397_v40  ;;  %400 = vst [vmem:[%s1261_s17 + $0xf8] sm:$0xff] %v399_v41  ;;  %v403_v43 = vld [vmem:[%s1265_s18 + $0x108] sm:$0xff]  ;;  %v405_v44 = vld [vmem:[%s1265_s18 + $0x110] sm:$0xff] }
 0x12c   : >> { %402 = vst [vmem:[%s1261_s17 + $0x100] sm:$0xff] %v401_v42  ;;  %v407_v45 = vld [vmem:[%s1265_s18 + $0x118] sm:$0xff]  ;;  %404 = vst [vmem:[%s1261_s17 + $0x108] sm:$0xff] %v403_v43  ;;  %v409_v46 = vld [vmem:[%s1265_s18 + $0x120] sm:$0xff] }
 0x12d   : >> { %406 = vst [vmem:[%s1261_s17 + $0x110] sm:$0xff] %v405_v44  ;;  %408 = vst [vmem:[%s1261_s17 + $0x118] sm:$0xff] %v407_v45  ;;  %v411_v47 = vld [vmem:[%s1265_s18 + $0x128] sm:$0xff]  ;;  %v413_v48 = vld [vmem:[%s1265_s18 + $0x130] sm:$0xff] }
 0x12e   : >> { %410 = vst [vmem:[%s1261_s17 + $0x120] sm:$0xff] %v409_v46  ;;  %412 = vst [vmem:[%s1261_s17 + $0x128] sm:$0xff] %v411_v47  ;;  %v415_v49 = vld [vmem:[%s1265_s18 + $0x138] sm:$0xff]  ;;  %v417_v50 = vld [vmem:[%s1265_s18 + $0x140] sm:$0xff] }
 0x12f   : >> { %414 = vst [vmem:[%s1261_s17 + $0x130] sm:$0xff] %v413_v48  ;;  %v419_v51 = vld [vmem:[%s1265_s18 + $0x148] sm:$0xff]  ;;  %416 = vst [vmem:[%s1261_s17 + $0x138] sm:$0xff] %v415_v49  ;;  %v421_v52 = vld [vmem:[%s1265_s18 + $0x150] sm:$0xff] }
 0x130   : >> { %418 = vst [vmem:[%s1261_s17 + $0x140] sm:$0xff] %v417_v50  ;;  %420 = vst [vmem:[%s1261_s17 + $0x148] sm:$0xff] %v419_v51  ;;  %v423_v53 = vld [vmem:[%s1265_s18 + $0x158] sm:$0xff]  ;;  %v425_v54 = vld [vmem:[%s1265_s18 + $0x160] sm:$0xff] }
 0x131   : >> { %422 = vst [vmem:[%s1261_s17 + $0x150] sm:$0xff] %v421_v52  ;;  %424 = vst [vmem:[%s1261_s17 + $0x158] sm:$0xff] %v423_v53  ;;  %v427_v55 = vld [vmem:[%s1265_s18 + $0x168] sm:$0xff]  ;;  %v429_v56 = vld [vmem:[%s1265_s18 + $0x170] sm:$0xff] }
 0x132   : >> { %426 = vst [vmem:[%s1261_s17 + $0x160] sm:$0xff] %v425_v54  ;;  %v431_v57 = vld [vmem:[%s1265_s18 + $0x178] sm:$0xff]  ;;  %428 = vst [vmem:[%s1261_s17 + $0x168] sm:$0xff] %v427_v55  ;;  %v433_v58 = vld [vmem:[%s1265_s18 + $0x180] sm:$0xff] }
 0x133   : >> { %430 = vst [vmem:[%s1261_s17 + $0x170] sm:$0xff] %v429_v56  ;;  %432 = vst [vmem:[%s1261_s17 + $0x178] sm:$0xff] %v431_v57  ;;  %v435_v59 = vld [vmem:[%s1265_s18 + $0x188] sm:$0xff]  ;;  %v437_v60 = vld [vmem:[%s1265_s18 + $0x190] sm:$0xff] }
 0x134   : >> { %434 = vst [vmem:[%s1261_s17 + $0x180] sm:$0xff] %v433_v58  ;;  %436 = vst [vmem:[%s1261_s17 + $0x188] sm:$0xff] %v435_v59  ;;  %v439_v61 = vld [vmem:[%s1265_s18 + $0x198] sm:$0xff]  ;;  %v441_v62 = vld [vmem:[%s1265_s18 + $0x1a0] sm:$0xff] }
 0x135   : >> { %438 = vst [vmem:[%s1261_s17 + $0x190] sm:$0xff] %v437_v60  ;;  %v443_v63 = vld [vmem:[%s1265_s18 + $0x1a8] sm:$0xff]  ;;  %440 = vst [vmem:[%s1261_s17 + $0x198] sm:$0xff] %v439_v61  ;;  %v445_v0 = vld [vmem:[%s1265_s18 + $0x1b0] sm:$0xff] }
 0x136   : >> { %442 = vst [vmem:[%s1261_s17 + $0x1a0] sm:$0xff] %v441_v62  ;;  %444 = vst [vmem:[%s1261_s17 + $0x1a8] sm:$0xff] %v443_v63  ;;  %v447_v1 = vld [vmem:[%s1265_s18 + $0x1b8] sm:$0xff]  ;;  %v449_v2 = vld [vmem:[%s1265_s18 + $0x1c0] sm:$0xff] }
 0x137   : >> { %446 = vst [vmem:[%s1261_s17 + $0x1b0] sm:$0xff] %v445_v0  ;;  %448 = vst [vmem:[%s1261_s17 + $0x1b8] sm:$0xff] %v447_v1  ;;  %v451_v3 = vld [vmem:[%s1265_s18 + $0x1c8] sm:$0xff]  ;;  %v453_v4 = vld [vmem:[%s1265_s18 + $0x1d0] sm:$0xff]  ;;  %333 = sbr.rel (!%p330_p2) target bundleno = 283 (0x11b), region = 155 }
 0x138   : >> { %450 = vst [vmem:[%s1261_s17 + $0x1c0] sm:$0xff] %v449_v2  ;;  %v455_v5 = vld [vmem:[%s1265_s18 + $0x1d8] sm:$0xff]  ;;  %452 = vst [vmem:[%s1261_s17 + $0x1c8] sm:$0xff] %v451_v3  ;;  %v457_v6 = vld [vmem:[%s1265_s18 + $0x1e0] sm:$0xff] }
 0x139   : >> { %454 = vst [vmem:[%s1261_s17 + $0x1d0] sm:$0xff] %v453_v4  ;;  %456 = vst [vmem:[%s1261_s17 + $0x1d8] sm:$0xff] %v455_v5  ;;  %v459_v7 = vld [vmem:[%s1265_s18 + $0x1e8] sm:$0xff]  ;;  %v461_v8 = vld [vmem:[%s1265_s18 + $0x1f0] sm:$0xff] }
 0x13a   : >> { %458 = vst [vmem:[%s1261_s17 + $0x1e0] sm:$0xff] %v457_v6  ;;  %460 = vst [vmem:[%s1261_s17 + $0x1e8] sm:$0xff] %v459_v7  ;;  %v463_v9 = vld [vmem:[%s1265_s18 + $0x1f8] sm:$0xff]  ;;  %s1871_s18 = smov %s1520_s27 }
 0x13b   : >> { %462 = vst [vmem:[%s1261_s17 + $0x1f0] sm:$0xff] %v461_v8  ;;  %464 = vst [vmem:[%s1261_s17 + $0x1f8] sm:$0xff] %v463_v9  ;;  %s1870_s17 = smov %s1523_s26 }
 0x13c PF: > { %s1629_s28 = sand.u32 63, %s324_s12   ;;  %s925_s29 = sshll.u32 %s1453_s15, 13 }
 0x13d   : > { %s476_s30 = sshra.s32 %s925_s29, 4  ;;  %p904_p3 = scmp.le.s32.totalorder %s1629_s28, 0 }
 0x13e   : > { %s477_s3 = scalar_lea.vmem %s1429_s19, %s476_s30 [#allocation4]   ;;  %s480_s4 = scalar_lea.vmem %s1440_s7, %s476_s30  }
 0x13f   : > { %791 = sbr.rel (%p904_p3) target bundleno = 332 (0x14c), region = 160  ;;  %s1275_s5 = smov (!%p904_p3), %s480_s4  }
 0x140   : > { %s1279_s6 = smov (!%p904_p3), %s477_s3   ;;  %s1283_s8 = smov (!%p904_p3), 0  }
 0x141   : > { %s1287_s23 = smov (!%p904_p3), 0  }
 0x144 LB: >> { %v492_v10 = vld [vmem:[%s1281_s6] sm:$0xff]  ;;  %s494_s12 = sadd.s32 1, %s1285_s8  ;;  %s486_s23 = sadd.s32 1, %s1289_s23   ;;  %s1289_s23 = sphi %s1287_s23, %s486_s23   ;;  %s1285_s8 = sphi %s1283_s8, %s1284_s8   ;;  %s1281_s6 = sphi %s1279_s6, %s499_s6   ;;  %s1277_s5 = sphi %s1275_s5, %s500_s5  }
 0x145   : >> { %493 = vst [vmem:[%s1277_s5] sm:$0xff] %v492_v10  ;;  %p495_p4 = scmp.ge.s32.totalorder %s494_s12, %s1629_s28  ;;  %p485_p5 = scmp.ge.s32.totalorder %s486_s23, %s1629_s28 }
 0x147   : >> { %s1892_s12 = smov (%p495_p4, %s494_s12), 0  ;;  %488 = sbr.rel (!%p485_p5) target bundleno = 324 (0x144), region = 166 }
 0x148   : >> { %s905_s15 = sshll.u32 %s1892_s12, 3  ;;  %s1284_s8 = smov %s1892_s12  }
 0x149   : >> { %s499_s6 = scalar_lea.vmem %s477_s3, %s905_s15 [#allocation4]   ;;  %s500_s5 = scalar_lea.vmem %s480_s4, %s905_s15  }
 0x14c PF: > { %503 = sbr.rel (%p320_p9) target bundleno = 396 (0x18c), region = 77  ;;  %s1641_s17 = ssub.s32 (!%p320_p9), %s1442_s9, %s1446_s21 }
 0x14d   : > { %s509_s18 = sshrl.u32 (!%p320_p9), %s1442_s9, 3  ;;  %s506_s22 = scalar_lea.vmem (!%p320_p9), %s1429_s19, %s1641_s17 [#allocation4] }
 0x14e   : > { %s508_s24 = scalar_lea.vmem (!%p320_p9), %s1440_s7, %s1641_s17  ;;  %s1650_s25 = sshrl.u32 (!%p320_p9), %s509_s18, 6 }
 0x14f   : > { %p907_p6 = scmp.le.s32.totalorder (!%p320_p9), %s1650_s25, 0 }
 0x151   : > { %805 = sbr.rel (%p907_p6) target bundleno = 375 (0x177), region = 171  ;;  %s1873_s27 = smov (!%p907_p6), %s1440_s7 }
 0x152   : > { %s1874_s26 = smov (!%p907_p6), %s1429_s19  ;;  %s1659_s28 = smov (!%p907_p6), 0  }
 0x153   : > { %s1661_s29 = smov (!%p907_p6), 0  }
 0x156 LB: >> { %v522_v11 = vld [vmem:[%s1297_s26] sm:$0xff]  ;;  %v524_v12 = vld [vmem:[%s1297_s26 + $0x8] sm:$0xff]  ;;  %v526_v13 = vld [vmem:[%s1297_s26 + $0x10] sm:$0xff]  ;;  %s650_s30 = sadd.s32 1, %s1301_s28  ;;  %s516_s29 = sadd.s32 1, %s1305_s29   ;;  %s1305_s29 = sphi %s1661_s29, %s516_s29   ;;  %s1301_s28 = sphi %s1659_s28, %s1877_s28   ;;  %s1297_s26 = sphi %s1874_s26, %s1876_s26   ;;  %s1293_s27 = sphi %s1873_s27, %s1875_s27  }
 0x157   : >> { %523 = vst [vmem:[%s1293_s27] sm:$0xff] %v522_v11  ;;  %525 = vst [vmem:[%s1293_s27 + $0x8] sm:$0xff] %v524_v12  ;;  %v528_v14 = vld [vmem:[%s1297_s26 + $0x18] sm:$0xff]  ;;  %v530_v15 = vld [vmem:[%s1297_s26 + $0x20] sm:$0xff]  ;;  %p651_p7 = scmp.ge.s32.totalorder %s650_s30, %s1650_s25  ;;  %p515_p10 = scmp.ge.s32.totalorder %s516_s29, %s1650_s25 }
 0x158   : >> { %527 = vst [vmem:[%s1293_s27 + $0x10] sm:$0xff] %v526_v13  ;;  %v532_v16 = vld [vmem:[%s1297_s26 + $0x28] sm:$0xff]  ;;  %529 = vst [vmem:[%s1293_s27 + $0x18] sm:$0xff] %v528_v14  ;;  %v534_v17 = vld [vmem:[%s1297_s26 + $0x30] sm:$0xff] }
 0x159   : >> { %531 = vst [vmem:[%s1293_s27 + $0x20] sm:$0xff] %v530_v15  ;;  %533 = vst [vmem:[%s1293_s27 + $0x28] sm:$0xff] %v532_v16  ;;  %v536_v18 = vld [vmem:[%s1297_s26 + $0x38] sm:$0xff]  ;;  %v538_v19 = vld [vmem:[%s1297_s26 + $0x40] sm:$0xff]  ;;  %s1894_s30 = smov (%p651_p7, %s650_s30), 0 }
 0x15a   : >> { %535 = vst [vmem:[%s1293_s27 + $0x30] sm:$0xff] %v534_v17  ;;  %537 = vst [vmem:[%s1293_s27 + $0x38] sm:$0xff] %v536_v18  ;;  %v540_v20 = vld [vmem:[%s1297_s26 + $0x48] sm:$0xff]  ;;  %v542_v21 = vld [vmem:[%s1297_s26 + $0x50] sm:$0xff]  ;;  %s908_s3 = sshll.u32 %s1894_s30, 9  ;;  %s1877_s28 = smov %s1894_s30 }
 0x15b   : >> { %539 = vst [vmem:[%s1293_s27 + $0x40] sm:$0xff] %v538_v19  ;;  %v544_v22 = vld [vmem:[%s1297_s26 + $0x58] sm:$0xff]  ;;  %541 = vst [vmem:[%s1293_s27 + $0x48] sm:$0xff] %v540_v20  ;;  %v546_v23 = vld [vmem:[%s1297_s26 + $0x60] sm:$0xff]  ;;  %s1717_s4 = scalar_lea.vmem %s1429_s19, %s908_s3 [#allocation4]   ;;  %s1720_s5 = scalar_lea.vmem %s1440_s7, %s908_s3  }
 0x15c   : >> { %543 = vst [vmem:[%s1293_s27 + $0x50] sm:$0xff] %v542_v21  ;;  %545 = vst [vmem:[%s1293_s27 + $0x58] sm:$0xff] %v544_v22  ;;  %v548_v24 = vld [vmem:[%s1297_s26 + $0x68] sm:$0xff]  ;;  %v550_v25 = vld [vmem:[%s1297_s26 + $0x70] sm:$0xff] }
 0x15d   : >> { %547 = vst [vmem:[%s1293_s27 + $0x60] sm:$0xff] %v546_v23  ;;  %549 = vst [vmem:[%s1293_s27 + $0x68] sm:$0xff] %v548_v24  ;;  %v552_v26 = vld [vmem:[%s1297_s26 + $0x78] sm:$0xff]  ;;  %v554_v27 = vld [vmem:[%s1297_s26 + $0x80] sm:$0xff] }
 0x15e   : >> { %551 = vst [vmem:[%s1293_s27 + $0x70] sm:$0xff] %v550_v25  ;;  %v556_v28 = vld [vmem:[%s1297_s26 + $0x88] sm:$0xff]  ;;  %553 = vst [vmem:[%s1293_s27 + $0x78] sm:$0xff] %v552_v26  ;;  %v558_v29 = vld [vmem:[%s1297_s26 + $0x90] sm:$0xff] }
 0x15f   : >> { %555 = vst [vmem:[%s1293_s27 + $0x80] sm:$0xff] %v554_v27  ;;  %557 = vst [vmem:[%s1293_s27 + $0x88] sm:$0xff] %v556_v28  ;;  %v560_v30 = vld [vmem:[%s1297_s26 + $0x98] sm:$0xff]  ;;  %v562_v31 = vld [vmem:[%s1297_s26 + $0xa0] sm:$0xff] }
 0x160   : >> { %559 = vst [vmem:[%s1293_s27 + $0x90] sm:$0xff] %v558_v29  ;;  %561 = vst [vmem:[%s1293_s27 + $0x98] sm:$0xff] %v560_v30  ;;  %v564_v32 = vld [vmem:[%s1297_s26 + $0xa8] sm:$0xff]  ;;  %v566_v33 = vld [vmem:[%s1297_s26 + $0xb0] sm:$0xff] }
 0x161   : >> { %563 = vst [vmem:[%s1293_s27 + $0xa0] sm:$0xff] %v562_v31  ;;  %v568_v34 = vld [vmem:[%s1297_s26 + $0xb8] sm:$0xff]  ;;  %565 = vst [vmem:[%s1293_s27 + $0xa8] sm:$0xff] %v564_v32  ;;  %v570_v35 = vld [vmem:[%s1297_s26 + $0xc0] sm:$0xff] }
 0x162   : >> { %567 = vst [vmem:[%s1293_s27 + $0xb0] sm:$0xff] %v566_v33  ;;  %569 = vst [vmem:[%s1293_s27 + $0xb8] sm:$0xff] %v568_v34  ;;  %v572_v36 = vld [vmem:[%s1297_s26 + $0xc8] sm:$0xff]  ;;  %v574_v37 = vld [vmem:[%s1297_s26 + $0xd0] sm:$0xff] }
 0x163   : >> { %571 = vst [vmem:[%s1293_s27 + $0xc0] sm:$0xff] %v570_v35  ;;  %573 = vst [vmem:[%s1293_s27 + $0xc8] sm:$0xff] %v572_v36  ;;  %v576_v38 = vld [vmem:[%s1297_s26 + $0xd8] sm:$0xff]  ;;  %v578_v39 = vld [vmem:[%s1297_s26 + $0xe0] sm:$0xff] }
 0x164   : >> { %575 = vst [vmem:[%s1293_s27 + $0xd0] sm:$0xff] %v574_v37  ;;  %v580_v40 = vld [vmem:[%s1297_s26 + $0xe8] sm:$0xff]  ;;  %577 = vst [vmem:[%s1293_s27 + $0xd8] sm:$0xff] %v576_v38  ;;  %v582_v41 = vld [vmem:[%s1297_s26 + $0xf0] sm:$0xff] }
 0x165   : >> { %579 = vst [vmem:[%s1293_s27 + $0xe0] sm:$0xff] %v578_v39  ;;  %581 = vst [vmem:[%s1293_s27 + $0xe8] sm:$0xff] %v580_v40  ;;  %v584_v42 = vld [vmem:[%s1297_s26 + $0xf8] sm:$0xff]  ;;  %v586_v43 = vld [vmem:[%s1297_s26 + $0x100] sm:$0xff] }
 0x166   : >> { %583 = vst [vmem:[%s1293_s27 + $0xf0] sm:$0xff] %v582_v41  ;;  %585 = vst [vmem:[%s1293_s27 + $0xf8] sm:$0xff] %v584_v42  ;;  %v588_v44 = vld [vmem:[%s1297_s26 + $0x108] sm:$0xff]  ;;  %v590_v45 = vld [vmem:[%s1297_s26 + $0x110] sm:$0xff] }
 0x167   : >> { %587 = vst [vmem:[%s1293_s27 + $0x100] sm:$0xff] %v586_v43  ;;  %v592_v46 = vld [vmem:[%s1297_s26 + $0x118] sm:$0xff]  ;;  %589 = vst [vmem:[%s1293_s27 + $0x108] sm:$0xff] %v588_v44  ;;  %v594_v47 = vld [vmem:[%s1297_s26 + $0x120] sm:$0xff] }
 0x168   : >> { %591 = vst [vmem:[%s1293_s27 + $0x110] sm:$0xff] %v590_v45  ;;  %593 = vst [vmem:[%s1293_s27 + $0x118] sm:$0xff] %v592_v46  ;;  %v596_v48 = vld [vmem:[%s1297_s26 + $0x128] sm:$0xff]  ;;  %v598_v49 = vld [vmem:[%s1297_s26 + $0x130] sm:$0xff] }
 0x169   : >> { %595 = vst [vmem:[%s1293_s27 + $0x120] sm:$0xff] %v594_v47  ;;  %597 = vst [vmem:[%s1293_s27 + $0x128] sm:$0xff] %v596_v48  ;;  %v600_v50 = vld [vmem:[%s1297_s26 + $0x138] sm:$0xff]  ;;  %v602_v51 = vld [vmem:[%s1297_s26 + $0x140] sm:$0xff] }
 0x16a   : >> { %599 = vst [vmem:[%s1293_s27 + $0x130] sm:$0xff] %v598_v49  ;;  %v604_v52 = vld [vmem:[%s1297_s26 + $0x148] sm:$0xff]  ;;  %601 = vst [vmem:[%s1293_s27 + $0x138] sm:$0xff] %v600_v50  ;;  %v606_v53 = vld [vmem:[%s1297_s26 + $0x150] sm:$0xff] }
 0x16b   : >> { %603 = vst [vmem:[%s1293_s27 + $0x140] sm:$0xff] %v602_v51  ;;  %605 = vst [vmem:[%s1293_s27 + $0x148] sm:$0xff] %v604_v52  ;;  %v608_v54 = vld [vmem:[%s1297_s26 + $0x158] sm:$0xff]  ;;  %v610_v55 = vld [vmem:[%s1297_s26 + $0x160] sm:$0xff] }
 0x16c   : >> { %607 = vst [vmem:[%s1293_s27 + $0x150] sm:$0xff] %v606_v53  ;;  %609 = vst [vmem:[%s1293_s27 + $0x158] sm:$0xff] %v608_v54  ;;  %v612_v56 = vld [vmem:[%s1297_s26 + $0x168] sm:$0xff]  ;;  %v614_v57 = vld [vmem:[%s1297_s26 + $0x170] sm:$0xff] }
 0x16d   : >> { %611 = vst [vmem:[%s1293_s27 + $0x160] sm:$0xff] %v610_v55  ;;  %v616_v58 = vld [vmem:[%s1297_s26 + $0x178] sm:$0xff]  ;;  %613 = vst [vmem:[%s1293_s27 + $0x168] sm:$0xff] %v612_v56  ;;  %v618_v59 = vld [vmem:[%s1297_s26 + $0x180] sm:$0xff] }
 0x16e   : >> { %615 = vst [vmem:[%s1293_s27 + $0x170] sm:$0xff] %v614_v57  ;;  %617 = vst [vmem:[%s1293_s27 + $0x178] sm:$0xff] %v616_v58  ;;  %v620_v60 = vld [vmem:[%s1297_s26 + $0x188] sm:$0xff]  ;;  %v622_v61 = vld [vmem:[%s1297_s26 + $0x190] sm:$0xff] }
 0x16f   : >> { %619 = vst [vmem:[%s1293_s27 + $0x180] sm:$0xff] %v618_v59  ;;  %621 = vst [vmem:[%s1293_s27 + $0x188] sm:$0xff] %v620_v60  ;;  %v624_v62 = vld [vmem:[%s1297_s26 + $0x198] sm:$0xff]  ;;  %v626_v63 = vld [vmem:[%s1297_s26 + $0x1a0] sm:$0xff] }
 0x170   : >> { %623 = vst [vmem:[%s1293_s27 + $0x190] sm:$0xff] %v622_v61  ;;  %v628_v0 = vld [vmem:[%s1297_s26 + $0x1a8] sm:$0xff]  ;;  %625 = vst [vmem:[%s1293_s27 + $0x198] sm:$0xff] %v624_v62  ;;  %v630_v1 = vld [vmem:[%s1297_s26 + $0x1b0] sm:$0xff] }
 0x171   : >> { %627 = vst [vmem:[%s1293_s27 + $0x1a0] sm:$0xff] %v626_v63  ;;  %629 = vst [vmem:[%s1293_s27 + $0x1a8] sm:$0xff] %v628_v0  ;;  %v632_v2 = vld [vmem:[%s1297_s26 + $0x1b8] sm:$0xff]  ;;  %v634_v3 = vld [vmem:[%s1297_s26 + $0x1c0] sm:$0xff] }
 0x172   : >> { %631 = vst [vmem:[%s1293_s27 + $0x1b0] sm:$0xff] %v630_v1  ;;  %633 = vst [vmem:[%s1293_s27 + $0x1b8] sm:$0xff] %v632_v2  ;;  %v636_v4 = vld [vmem:[%s1297_s26 + $0x1c8] sm:$0xff]  ;;  %v638_v5 = vld [vmem:[%s1297_s26 + $0x1d0] sm:$0xff]  ;;  %518 = sbr.rel (!%p515_p10) target bundleno = 342 (0x156), region = 177 }
 0x173   : >> { %635 = vst [vmem:[%s1293_s27 + $0x1c0] sm:$0xff] %v634_v3  ;;  %v640_v6 = vld [vmem:[%s1297_s26 + $0x1d8] sm:$0xff]  ;;  %637 = vst [vmem:[%s1293_s27 + $0x1c8] sm:$0xff] %v636_v4  ;;  %v642_v7 = vld [vmem:[%s1297_s26 + $0x1e0] sm:$0xff] }
 0x174   : >> { %639 = vst [vmem:[%s1293_s27 + $0x1d0] sm:$0xff] %v638_v5  ;;  %641 = vst [vmem:[%s1293_s27 + $0x1d8] sm:$0xff] %v640_v6  ;;  %v644_v8 = vld [vmem:[%s1297_s26 + $0x1e8] sm:$0xff]  ;;  %v646_v9 = vld [vmem:[%s1297_s26 + $0x1f0] sm:$0xff] }
 0x175   : >> { %643 = vst [vmem:[%s1293_s27 + $0x1e0] sm:$0xff] %v642_v7  ;;  %645 = vst [vmem:[%s1293_s27 + $0x1e8] sm:$0xff] %v644_v8  ;;  %v648_v10 = vld [vmem:[%s1297_s26 + $0x1f8] sm:$0xff]  ;;  %s1876_s26 = smov %s1717_s4 }
 0x176   : >> { %647 = vst [vmem:[%s1293_s27 + $0x1f0] sm:$0xff] %v646_v9  ;;  %649 = vst [vmem:[%s1293_s27 + $0x1f8] sm:$0xff] %v648_v10  ;;  %s1875_s27 = smov %s1720_s5 }
 0x177 PF: > { %s1826_s6 = sand.u32 63, %s509_s18   ;;  %s927_s8 = sshll.u32 %s1650_s25, 13 }
 0x178   : > { %s661_s23 = sshra.s32 %s927_s8, 4  ;;  %p913_p8 = scmp.le.s32.totalorder %s1826_s6, 0 }
 0x179   : > { %s662_s12 = scalar_lea.vmem %s1429_s19, %s661_s23 [#allocation4]   ;;  %s665_s15 = scalar_lea.vmem %s1440_s7, %s661_s23  }
 0x17a   : > { %819 = sbr.rel (%p913_p8) target bundleno = 391 (0x187), region = 182  ;;  %s1307_s3 = smov (!%p913_p8), %s665_s15  }
 0x17b   : > { %s1311_s30 = smov (!%p913_p8), %s662_s12   ;;  %s1315_s4 = smov (!%p913_p8), 0  }
 0x17c   : > { %s1319_s29 = smov (!%p913_p8), 0  }
 0x17f LB: >> { %v677_v11 = vld [vmem:[%s1313_s30] sm:$0xff]  ;;  %s679_s18 = sadd.s32 1, %s1317_s4  ;;  %s671_s29 = sadd.s32 1, %s1321_s29   ;;  %s1321_s29 = sphi %s1319_s29, %s671_s29   ;;  %s1317_s4 = sphi %s1315_s4, %s1316_s4   ;;  %s1313_s30 = sphi %s1311_s30, %s684_s30   ;;  %s1309_s3 = sphi %s1307_s3, %s685_s3  }
 0x180   : >> { %678 = vst [vmem:[%s1309_s3] sm:$0xff] %v677_v11  ;;  %p680_p11 = scmp.ge.s32.totalorder %s679_s18, %s1826_s6  ;;  %p670_p12 = scmp.ge.s32.totalorder %s671_s29, %s1826_s6 }
 0x182   : >> { %s1896_s18 = smov (%p680_p11, %s679_s18), 0  ;;  %673 = sbr.rel (!%p670_p12) target bundleno = 383 (0x17f), region = 188 }
 0x183   : >> { %s914_s25 = sshll.u32 %s1896_s18, 3  ;;  %s1316_s4 = smov %s1896_s18  }
 0x184   : >> { %s684_s30 = scalar_lea.vmem %s662_s12, %s914_s25 [#allocation4]   ;;  %s685_s3 = scalar_lea.vmem %s665_s15, %s914_s25  }
 0x187 PF: > { %s1327_s27 = smov 1  }
 0x188   : > { %s686_s26 = sshll.u32 %s1327_s27, %s1446_s21 }
 0x189   : > { %s916_s28 = sadd.s32 4294967295, %s686_s26 }
 0x18a   : > { %v696_v12 = vld [vmem:[%s506_s22] sm:%s916_s28] }
 0x18b   : > { %697 = vst [vmem:[%s508_s24] sm:%s916_s28] %v696_v12 }
 0x18c PF: > { %p917_p9 = scmp.ge.u32.totalorder %s1442_s9, 8 }
 0x18d   : > { %s1328_s5 = smov (!%p917_p9), 1  }
 0x18e   : > { %306 = sbr.rel (%p917_p9) target bundleno = 405 (0x195), region = 48  ;;  %s307_s6 = sshll.u32 (!%p917_p9), %s1328_s5, %s1442_s9 }
 0x18f   : > { %s918_s8 = sadd.s32 (!%p917_p9), 4294967295, %s307_s6 }
 0x193   : > { %v317_v13 = vld [vmem:[%s1429_s19] sm:%s918_s8] }
 0x194   : > { %318 = vst [vmem:[%s1440_s7] sm:%s918_s8] %v317_v13 }
 0x195 PF: > { %s15_s14 = sadd.s32 1, %s1257_s14   ;;  %s1878_s9 = smov %s1241_s10 }
 0x196   : > { %p12_p13 = scmp.ge.s32.totalorder %s15_s14, 4   ;;  %s1879_s10 = smov %s1245_s11 }
 0x197   : > { %s1880_s11 = smov %s1388_s20  ;;  %s1881_s12 = smov %s1253_s13 }
 0x198   : > { %s1882_s13 = smov %s1884_s16  ;;  %14 = sbr.rel (!%p12_p13) target bundleno = 4 (0x4), region = 199 }
 0x19d   :  { %711 = vsyncpa [#allocation3], 1 }
 0x19e   :  { %713 = vsyncpa [#allocation3 + $0x1], 1 }

</bundles_post_ra>
